<compile_context>
chip_gen: v6e
topology: v6e:2x2x1
jax: 0.10.0
libtpu: 0.0.40
codegen_flags: <defaults>
</compile_context>

<pallas_src>
import math

import jax
import jax.numpy as jnp
import numpy as np
from jax.experimental import pallas as pl
from jax.experimental.pallas import tpu as pltpu

# ----- module hyper-parameters (RelativePitchDifferenceLoss.__init__) -------
CQT_CENTER    = 16
CQT_SHIFT_MIN = -8
CQT_SHIFT_MAX = 8
PITCH_FREQ    = 128
DELTA         = 0.125
SIGMA         = 1.0 / 12.0

INV_LN2 = 1.0 / math.log(2.0)   # log2(exp(x)) == x * INV_LN2

# ----- small example shapes --------------------------------------------------
B       = 2       # batch
F_TOTAL = 160     # total CQT bins (>= CQT_CENTER + CQT_SHIFT_MAX + PITCH_FREQ)
T       = 256     # time frames
T_TILE  = 128     # frames per grid step  -> B*T_TILE = 256 lanes per MXU call
HIDDEN  = 32      # synthetic pitch-encoder hidden width

WIN_LO = CQT_CENTER + CQT_SHIFT_MIN                       # 8
WIN_SZ = (CQT_SHIFT_MAX - CQT_SHIFT_MIN) + PITCH_FREQ     # 144 (shift superset)


def _rpd_loss_kernel(shift_ref,        # SMEM int32 [B]            (scalar prefetch)
                     cqt_ref,          # VMEM f32   [B, WIN_SZ, T_TILE]
                     pitch_ref,        # VMEM f32   [1, 1, B*T_TILE] (tile-major)
                     shift_cols_ref,   # VMEM f32   [1, B*T_TILE]    (sigma*shift)
                     w1_ref, b1_ref,   # VMEM       [H, PF], [H, 1]
                     w2_ref, b2_ref,   # VMEM       [1, H],  [1, 1]
                     out_ref,          # VMEM f32   [1, 1, B*T_TILE] per-frame Huber
                     x_scratch):       # VMEM bf16  [PF, B*T_TILE]
    # --- per-sample window extraction, written straight into the fused MXU
    #     activation layout (lane offsets i*T_TILE are 128-aligned -> unmasked
    #     stores; no concatenate / relayout afterwards). -----------------------
    for i in range(B):
        off = shift_ref[i] - CQT_SHIFT_MIN            # offset inside superset window
        win = cqt_ref[i, pl.ds(off, PITCH_FREQ), :]   # [PF, T_TILE] f32
        x_scratch[:, i * T_TILE:(i + 1) * T_TILE] = win.astype(jnp.bfloat16)

    x16 = x_scratch[...]                              # [PF, B*T_TILE] bf16
    w1_16 = w1_ref[...].astype(jnp.bfloat16)
    w2_16 = w2_ref[...].astype(jnp.bfloat16)

    # Synthetic PitchEncoder (2-layer MLP over bins, exp head), f32 accumulation.
    h = jnp.dot(w1_16, x16, preferred_element_type=jnp.float32) + b1_ref[...]
    h = jnp.maximum(h, 0.0)                                          # [H, B*T_TILE]
    logits = (jnp.dot(w2_16, h.astype(jnp.bfloat16),
                      preferred_element_type=jnp.float32)
              + b2_ref[...])                                         # [1, B*T_TILE]

    # predicted_transposed_pitch = exp(logits)  =>  log2(pred) = logits / ln(2).
    pred_log2 = logits * INV_LN2 + shift_cols_ref[...]               # [1, B*T_TILE]
    tgt_log2 = jnp.log2(pitch_ref[0])                                # [1, B*T_TILE]

    # Huber(pred_log2, tgt_log2; delta) per frame; mean reduction in wrapper.
    diff = pred_log2 - tgt_log2
    absd = jnp.abs(diff)
    hub = jnp.where(absd <= DELTA, 0.5 * diff * diff,
                    DELTA * (absd - 0.5 * DELTA))
    out_ref[0, :, :] = hub


def relative_pitch_difference_loss(cqt, pitch, shift, w1, b1, w2, b2):
    assert cqt.shape == (B, F_TOTAL, T) and pitch.shape == (B, T)
    assert T % T_TILE == 0
    assert WIN_LO >= 0 and WIN_LO + WIN_SZ <= F_TOTAL
    num_tiles = T // T_TILE

    # Clamp the transposition so the in-kernel window slice can never leave the
    # superset window (review correctness concern).
    shift = jnp.clip(shift, CQT_SHIFT_MIN, CQT_SHIFT_MAX).astype(jnp.int32)

    # Static shift-superset window of the CQT: everything any legal shift can read.
    cqt_win = jax.lax.slice_in_dim(cqt, WIN_LO, WIN_LO + WIN_SZ, axis=1)  # [B, 144, T]

    # Wrapper-side layout plumbing (pure glue, zero kernel cost):
    #   pitch in tile-major, sample-major-within-tile order  -> [NT, 1, B*T_TILE]
    #   sigma*shift broadcast over each sample's frames       -> [1,  B*T_TILE]
    pitch_tiled = (pitch.reshape(B, num_tiles, T_TILE)
                        .transpose(1, 0, 2)
                        .reshape(num_tiles, 1, B * T_TILE))
    shift_cols = jnp.repeat(SIGMA * shift.astype(jnp.float32),
                            T_TILE).reshape(1, B * T_TILE)

    grid_spec = pltpu.PrefetchScalarGridSpec(
        num_scalar_prefetch=1,                  # shift -> SMEM (drives window slice)
        grid=(num_tiles,),                      # frame-tile axis, fully parallel
        in_specs=[
            pl.BlockSpec((B, WIN_SZ, T_TILE), lambda t, s: (0, 0, t)),    # cqt window
            pl.BlockSpec((1, 1, B * T_TILE), lambda t, s: (t, 0, 0)),     # pitch
            pl.BlockSpec((1, B * T_TILE), lambda t, s: (0, 0)),           # sigma*shift
            pl.BlockSpec((HIDDEN, PITCH_FREQ), lambda t, s: (0, 0)),      # W1
            pl.BlockSpec((HIDDEN, 1), lambda t, s: (0, 0)),               # b1
            pl.BlockSpec((1, HIDDEN), lambda t, s: (0, 0)),               # W2
            pl.BlockSpec((1, 1), lambda t, s: (0, 0)),                    # b2
        ],
        out_specs=pl.BlockSpec((1, 1, B * T_TILE), lambda t, s: (t, 0, 0)),
        scratch_shapes=[
            pltpu.VMEM((PITCH_FREQ, B * T_TILE), jnp.bfloat16),  # fused MXU feed
        ],
    )
    # VMEM budget (per tile, double-buffered cqt block ~2*144 KiB + 64 KiB scratch
    # + small operands) is well under every generation's scoped default; 16 MiB is
    # explicit and safe on v5e/v6e/v7x alike.
    # TODO(synk): for production T, re-budget T_TILE against v7x's 64 MiB physical
    # VMEM (roughly half a v6e-sized tile) while keeping B*T_TILE a 128-multiple.
    hub = pl.pallas_call(
        _rpd_loss_kernel,
        out_shape=jax.ShapeDtypeStruct((num_tiles, 1, B * T_TILE), jnp.float32),
        grid_spec=grid_spec,
        compiler_params=pltpu.CompilerParams(
            dimension_semantics=("parallel",),       # lets v7x use both TensorCores
            vmem_limit_bytes=16 * 1024 * 1024,
        ),
    )(shift, cqt_win, pitch_tiled, shift_cols, w1, b1, w2, b2)

    # 'mean' Huber reduction over all B*T frames (tile partials reduced outside,
    # as recommended for the parallel grid axis).
    return jnp.mean(hub)


def reference_loss(cqt, pitch, shift, w1, b1, w2, b2):
    """Pure-JAX reference for the same forward pass (same bf16 matmul inputs)."""
    shift = jnp.clip(shift, CQT_SHIFT_MIN, CQT_SHIFT_MAX)
    start = shift + CQT_CENTER
    windows = [jax.lax.dynamic_slice(cqt[i], (start[i], 0), (PITCH_FREQ, T))
               for i in range(B)]
    x16 = jnp.stack(windows).astype(jnp.bfloat16)                     # [B, PF, T]
    h = jnp.maximum(
        jnp.einsum('hp,bpt->bht', w1.astype(jnp.bfloat16), x16,
                   preferred_element_type=jnp.float32) + b1[None], 0.0)
    logits = (jnp.einsum('oh,bht->bot', w2.astype(jnp.bfloat16),
                         h.astype(jnp.bfloat16),
                         preferred_element_type=jnp.float32) + b2[None])  # [B,1,T]
    pred_log2 = (logits[:, 0, :] * INV_LN2
                 + SIGMA * shift.astype(jnp.float32)[:, None])            # [B, T]
    tgt_log2 = jnp.log2(pitch)
    d = pred_log2 - tgt_log2
    a = jnp.abs(d)
    hub = jnp.where(a <= DELTA, 0.5 * d * d, DELTA * (a - 0.5 * DELTA))
    return jnp.mean(hub)


if __name__ == "__main__":
    key = jax.random.PRNGKey(0)
    k_cqt, k_pitch, k_shift, k_w1, k_w2 = jax.random.split(key, 5)

    cqt = jax.random.normal(k_cqt, (B, F_TOTAL, T), dtype=jnp.float32)
    pitch = jax.random.uniform(k_pitch, (B, T), minval=50.0, maxval=500.0,
                               dtype=jnp.float32)
    # torch.randint(cqt_shift_min, cqt_shift_max + 1, (bsize,)) analogue, drawn
    # deterministically in the wrapper (randomness is glue, not compute).
    shift = jax.random.randint(k_shift, (B,), CQT_SHIFT_MIN, CQT_SHIFT_MAX + 1,
                               dtype=jnp.int32)

    # Deterministic synthetic PitchEncoder parameters.
    w1 = 0.02 * jax.random.normal(k_w1, (HIDDEN, PITCH_FREQ), dtype=jnp.float32)
    b1 = jnp.zeros((HIDDEN, 1), dtype=jnp.float32)
    w2 = 0.02 * jax.random.normal(k_w2, (1, HIDDEN), dtype=jnp.float32)
    b2 = jnp.full((1, 1), float(np.log(200.0)), dtype=jnp.float32)  # ~200 Hz prior

    loss = jax.block_until_ready(
        relative_pitch_difference_loss(cqt, pitch, shift, w1, b1, w2, b2))
    ref = jax.block_until_ready(
        reference_loss(cqt, pitch, shift, w1, b1, w2, b2))
    np.testing.assert_allclose(np.asarray(loss), np.asarray(ref),
                               rtol=1e-2, atol=1e-4)
    print("KERNEL_OK")
</pallas_src>

<mosaic_0001>
module attributes {stable_mosaic.version = 11 : i64} {
  func.func @_rpd_loss_kernel(%arg0: i32, %arg1: memref<2xi32, #tpu.memory_space<smem>>, %arg2: memref<2x144x128xf32, #tpu.memory_space<vmem>>, %arg3: memref<1x1x256xf32, #tpu.memory_space<vmem>>, %arg4: memref<1x256xf32, #tpu.memory_space<vmem>>, %arg5: memref<32x128xf32, #tpu.memory_space<vmem>>, %arg6: memref<32x1xf32, #tpu.memory_space<vmem>>, %arg7: memref<1x32xf32, #tpu.memory_space<vmem>>, %arg8: memref<1x1xf32, #tpu.memory_space<vmem>>, %arg9: memref<1x1x256xf32, #tpu.memory_space<vmem>>, %arg10: memref<128x256xbf16, #tpu.memory_space<vmem>>) attributes {dimension_semantics = [#tpu.dimension_semantics<parallel>], iteration_bounds = array<i64: 2>, scalar_prefetch = 1 : i64, scratch_operands = 1 : i64, tpu.core_type = #tpu.core_type<tc>, window_params = [{transform_indices = @transform_0, window_bounds = array<i64: 2, 144, 128>}, {transform_indices = @transform_1, window_bounds = array<i64: 1, 1, 256>}, {pipeline_mode = #tpu.pipeline_mode<synchronous>, transform_indices = @transform_2, window_bounds = array<i64: 1, 256>}, {pipeline_mode = #tpu.pipeline_mode<synchronous>, transform_indices = @transform_3, window_bounds = array<i64: 32, 128>}, {pipeline_mode = #tpu.pipeline_mode<synchronous>, transform_indices = @transform_4, window_bounds = array<i64: 32, 1>}, {pipeline_mode = #tpu.pipeline_mode<synchronous>, transform_indices = @transform_5, window_bounds = array<i64: 1, 32>}, {pipeline_mode = #tpu.pipeline_mode<synchronous>, transform_indices = @transform_6, window_bounds = array<i64: 1, 1>}, {transform_indices = @transform_7, window_bounds = array<i64: 1, 1, 256>}]} {
    %c0 = arith.constant 0 : index
    %0 = memref.load %arg1[%c0] : memref<2xi32, #tpu.memory_space<smem>>
    %c-8_i32 = arith.constant -8 : i32
    %1 = arith.subi %0, %c-8_i32 : i32
    %c0_0 = arith.constant 0 : index
    %2 = arith.index_cast %1 : i32 to index
    %c0_1 = arith.constant 0 : index
    %3 = vector.load %arg2[%c0_0, %2, %c0_1] : memref<2x144x128xf32, #tpu.memory_space<vmem>>, vector<1x128x128xf32>
    %4 = vector.shape_cast %3 : vector<1x128x128xf32> to vector<128x128xf32>
    %5 = arith.truncf %4 : vector<128x128xf32> to vector<128x128xbf16>
    %c0_2 = arith.constant 0 : index
    %c0_3 = arith.constant 0 : index
    %6 = vector.load %arg10[%c0_2, %c0_3] : memref<128x256xbf16, #tpu.memory_space<vmem>>, vector<128x128xbf16>
    tpu.vector_store %arg10[%c0_2, %c0_3], %5 {strides = array<i32>} : memref<128x256xbf16, #tpu.memory_space<vmem>>, vector<128x128xbf16>,
    %c1 = arith.constant 1 : index
    %7 = memref.load %arg1[%c1] : memref<2xi32, #tpu.memory_space<smem>>
    %c-8_i32_4 = arith.constant -8 : i32
    %8 = arith.subi %7, %c-8_i32_4 : i32
    %c1_5 = arith.constant 1 : index
    %9 = arith.index_cast %8 : i32 to index
    %c0_6 = arith.constant 0 : index
    %10 = vector.load %arg2[%c1_5, %9, %c0_6] : memref<2x144x128xf32, #tpu.memory_space<vmem>>, vector<1x128x128xf32>
    %11 = vector.shape_cast %10 : vector<1x128x128xf32> to vector<128x128xf32>
    %12 = arith.truncf %11 : vector<128x128xf32> to vector<128x128xbf16>
    %c0_7 = arith.constant 0 : index
    %c128 = arith.constant 128 : index
    %13 = vector.load %arg10[%c0_7, %c128] : memref<128x256xbf16, #tpu.memory_space<vmem>>, vector<128x128xbf16>
    tpu.vector_store %arg10[%c0_7, %c128], %12 {strides = array<i32>} : memref<128x256xbf16, #tpu.memory_space<vmem>>, vector<128x128xbf16>,
    %c0_8 = arith.constant 0 : index
    %c0_9 = arith.constant 0 : index
    %14 = vector.load %arg10[%c0_8, %c0_9] : memref<128x256xbf16, #tpu.memory_space<vmem>>, vector<128x256xbf16>
    %c0_10 = arith.constant 0 : index
    %c0_11 = arith.constant 0 : index
    %15 = vector.load %arg5[%c0_10, %c0_11] : memref<32x128xf32, #tpu.memory_space<vmem>>, vector<32x128xf32>
    %16 = arith.truncf %15 : vector<32x128xf32> to vector<32x128xbf16>
    %c0_12 = arith.constant 0 : index
    %c0_13 = arith.constant 0 : index
    %17 = vector.load %arg7[%c0_12, %c0_13] : memref<1x32xf32, #tpu.memory_space<vmem>>, vector<1x32xf32>
    %18 = arith.truncf %17 : vector<1x32xf32> to vector<1x32xbf16>
    %cst = arith.constant dense<0.000000e+00> : vector<32x256xf32>
    %19 = tpu.matmul %16, %14, %cst {dimension_numbers = #tpu.dot_dimension_numbers<[1], [0], [0], [1], [0, 0, 1, 1], [], []>} : vector<32x128xbf16>, vector<128x256xbf16>, vector<32x256xf32> -> vector<32x256xf32>
    %c0_14 = arith.constant 0 : index
    %c0_15 = arith.constant 0 : index
    %20 = vector.load %arg6[%c0_14, %c0_15] : memref<32x1xf32, #tpu.memory_space<vmem>>, vector<32x1xf32>
    %21 = vector.broadcast %20 : vector<32x1xf32> to vector<32x256xf32>
    %22 = arith.addf %19, %21 : vector<32x256xf32>
    %cst_16 = arith.constant 0.000000e+00 : f32
    %23 = vector.broadcast %cst_16 : f32 to vector<32x256xf32>
    %24 = arith.maximumf %22, %23 : vector<32x256xf32>
    %25 = arith.truncf %24 : vector<32x256xf32> to vector<32x256xbf16>
    %cst_17 = arith.constant dense<0.000000e+00> : vector<1x256xf32>
    %26 = tpu.matmul %18, %25, %cst_17 {dimension_numbers = #tpu.dot_dimension_numbers<[1], [0], [0], [1], [0, 0, 1, 1], [], []>} : vector<1x32xbf16>, vector<32x256xbf16>, vector<1x256xf32> -> vector<1x256xf32>
    %c0_18 = arith.constant 0 : index
    %c0_19 = arith.constant 0 : index
    %27 = vector.load %arg8[%c0_18, %c0_19] : memref<1x1xf32, #tpu.memory_space<vmem>>, vector<1x1xf32>
    %28 = vector.broadcast %27 : vector<1x1xf32> to vector<1x256xf32>
    %29 = arith.addf %26, %28 : vector<1x256xf32>
    %cst_20 = arith.constant 1.44269502 : f32
    %30 = vector.broadcast %cst_20 : f32 to vector<1x256xf32>
    %31 = arith.mulf %29, %30 : vector<1x256xf32>
    %c0_21 = arith.constant 0 : index
    %c0_22 = arith.constant 0 : index
    %32 = vector.load %arg4[%c0_21, %c0_22] : memref<1x256xf32, #tpu.memory_space<vmem>>, vector<1x256xf32>
    %33 = arith.addf %31, %32 : vector<1x256xf32>
    %c0_23 = arith.constant 0 : index
    %c0_24 = arith.constant 0 : index
    %c0_25 = arith.constant 0 : index
    %34 = vector.load %arg3[%c0_23, %c0_24, %c0_25] : memref<1x1x256xf32, #tpu.memory_space<vmem>>, vector<1x1x256xf32>
    %35 = vector.shape_cast %34 : vector<1x1x256xf32> to vector<1x256xf32>
    %36 = math.log %35 : vector<1x256xf32>
    %cst_26 = arith.constant 2.000000e+00 : f32
    %37 = math.log %cst_26 : f32
    %38 = vector.broadcast %37 : f32 to vector<1x256xf32>
    %39 = arith.divf %36, %38 : vector<1x256xf32>
    %40 = arith.subf %33, %39 : vector<1x256xf32>
    %41 = math.absf %40 : vector<1x256xf32>
    %cst_27 = arith.constant 1.250000e-01 : f32
    %42 = vector.broadcast %cst_27 : f32 to vector<1x256xf32>
    %43 = arith.cmpf ole, %41, %42 : vector<1x256xf32>
    %cst_28 = arith.constant 5.000000e-01 : f32
    %44 = vector.broadcast %cst_28 : f32 to vector<1x256xf32>
    %45 = arith.mulf %44, %40 : vector<1x256xf32>
    %46 = arith.mulf %45, %40 : vector<1x256xf32>
    %cst_29 = arith.constant 6.250000e-02 : f32
    %47 = vector.broadcast %cst_29 : f32 to vector<1x256xf32>
    %48 = arith.subf %41, %47 : vector<1x256xf32>
    %cst_30 = arith.constant 1.250000e-01 : f32
    %49 = vector.broadcast %cst_30 : f32 to vector<1x256xf32>
    %50 = arith.mulf %49, %48 : vector<1x256xf32>
    %51 = arith.select %43, %46, %50 : vector<1x256xi1>, vector<1x256xf32>
    %c0_31 = arith.constant 0 : index
    %c0_32 = arith.constant 0 : index
    %c0_33 = arith.constant 0 : index
    %52 = vector.load %arg9[%c0_31, %c0_32, %c0_33] : memref<1x1x256xf32, #tpu.memory_space<vmem>>, vector<1x1x256xf32>
    %53 = vector.shape_cast %52 : vector<1x1x256xf32> to vector<1x256xf32>
    %54 = vector.shape_cast %51 : vector<1x256xf32> to vector<1x1x256xf32>
    tpu.vector_store %arg9[%c0_31, %c0_32, %c0_33], %54 {strides = array<i32>} : memref<1x1x256xf32, #tpu.memory_space<vmem>>, vector<1x1x256xf32>,
    return
  }
  func.func @transform_0(%arg0: i32, %arg1: memref<2xi32, #tpu.memory_space<smem>>) -> (i32, i32, i32) {
    %c0_i32 = arith.constant 0 : i32
    %c0_i32_0 = arith.constant 0 : i32
    %c0_i32_1 = arith.constant 0 : i32
    return %c0_i32, %c0_i32_0, %arg0 : i32, i32, i32
  }
  func.func @transform_1(%arg0: i32, %arg1: memref<2xi32, #tpu.memory_space<smem>>) -> (i32, i32, i32) {
    %c0_i32 = arith.constant 0 : i32
    %c0_i32_0 = arith.constant 0 : i32
    %c0_i32_1 = arith.constant 0 : i32
    return %arg0, %c0_i32, %c0_i32_0 : i32, i32, i32
  }
  func.func @transform_2(%arg0: i32, %arg1: memref<2xi32, #tpu.memory_space<smem>>) -> (i32, i32) {
    %c0_i32 = arith.constant 0 : i32
    %c0_i32_0 = arith.constant 0 : i32
    %c0_i32_1 = arith.constant 0 : i32
    return %c0_i32, %c0_i32_0 : i32, i32
  }
  func.func @transform_3(%arg0: i32, %arg1: memref<2xi32, #tpu.memory_space<smem>>) -> (i32, i32) {
    %c0_i32 = arith.constant 0 : i32
    %c0_i32_0 = arith.constant 0 : i32
    %c0_i32_1 = arith.constant 0 : i32
    return %c0_i32, %c0_i32_0 : i32, i32
  }
  func.func @transform_4(%arg0: i32, %arg1: memref<2xi32, #tpu.memory_space<smem>>) -> (i32, i32) {
    %c0_i32 = arith.constant 0 : i32
    %c0_i32_0 = arith.constant 0 : i32
    %c0_i32_1 = arith.constant 0 : i32
    return %c0_i32, %c0_i32_0 : i32, i32
  }
  func.func @transform_5(%arg0: i32, %arg1: memref<2xi32, #tpu.memory_space<smem>>) -> (i32, i32) {
    %c0_i32 = arith.constant 0 : i32
    %c0_i32_0 = arith.constant 0 : i32
    %c0_i32_1 = arith.constant 0 : i32
    return %c0_i32, %c0_i32_0 : i32, i32
  }
  func.func @transform_6(%arg0: i32, %arg1: memref<2xi32, #tpu.memory_space<smem>>) -> (i32, i32) {
    %c0_i32 = arith.constant 0 : i32
    %c0_i32_0 = arith.constant 0 : i32
    %c0_i32_1 = arith.constant 0 : i32
    return %c0_i32, %c0_i32_0 : i32, i32
  }
  func.func @transform_7(%arg0: i32, %arg1: memref<2xi32, #tpu.memory_space<smem>>) -> (i32, i32, i32) {
    %c0_i32 = arith.constant 0 : i32
    %c0_i32_0 = arith.constant 0 : i32
    %c0_i32_1 = arith.constant 0 : i32
    return %arg0, %c0_i32, %c0_i32_0 : i32, i32, i32
  }
}

</mosaic_0001>

<bundles_post_ra>
// kernel: tpu_custom_call.1
= control target key start
LH: loop header
LB: loop body
LE: loop exit
PB: predicated region body
PF: predicated region fallthrough
CT: control target
= control target key end

     0   :  { %s1518_s0 = inlined_call_operand.vmem [shape: s32[2], index: 0, kind: input, shape index: {}]   ;;  %s1519_s1 = inlined_call_operand.hbm [shape: f32[2,144,256], index: 1, kind: input, shape index: {}]   ;;  %s1520_s2 = inlined_call_operand.vmem [shape: f32[2,1,256], index: 2, kind: input, shape index: {}]   ;;  %s1521_s3 = inlined_call_operand.vmem [shape: f32[1,256], index: 3, kind: input, shape index: {}]   ;;  %s1522_s4 = inlined_call_operand.vmem [shape: f32[32,128], index: 4, kind: input, shape index: {}]   ;;  %s1523_s5 = inlined_call_operand.vmem [shape: f32[32,1], index: 5, kind: input, shape index: {}]   ;;  %s1524_s6 = inlined_call_operand.vmem [shape: f32[1,32], index: 6, kind: input, shape index: {}]   ;;  %s1525_s8 = inlined_call_operand.hbm [shape: f32[2,1,256], index: 8, kind: output, shape index: {}]   ;;  %s1526_s7 = inlined_call_operand.<no memory space> [shape: f32[1,1], index: 7, kind: input, shape index: {}]  }
   0x1   :  { %s13_s29 = sshll.u32 %s1518_s0, 4  ;;  %v17_v0 = vstv %s1526_s7  ;;  %s14_s29 = int_to_ptr.vmem [resolvable:$true] %s13_s29 }
   0x2   :  { %18 = vst [vmem:[#allocation5] sm:$0x1] %v17_v0  ;;  %s1138_s10 = scalar_lea.vmem %s14_s29, 16  ;;  %p1143_p1 = scmp.lt.s32.totalorder %s14_s29, %s14_s29 }
   0x3   :  { %p1139_p0 = scmp.ne.s32.totalorder %s14_s29, %s1138_s10  ;;  %p1144_p2 = scmp.lt.s32.totalorder %s1138_s10, %s1138_s10 }
   0x5   :  { %p1145_p3 = por %p1144_p2, %p1143_p1 }
   0x7   :  { %p1146_p4 = pnand %p1145_p3, %p1139_p0 }
   0x9   :  { %1149 = shalt.err (!%p1146_p4)  }
   0xa   :  { %s1246_s11 = smov [#allocation4]  }
   0xb   :  { %16 = dma.vmem_to_smem %s14_s29, 16, %s1246_s11, [#allocation3] }
   0xc   :  { %1220 = dma.done.wait [#allocation3], 16 }
   0xd   :  { %1221 = vsyncadd [#allocation3], 4294967280 }
   0xe   :  { %20 = sfence }
   0xf   :  { %21 = vsyncpa [#allocation7], 0 }
  0x10   :  { %23 = vsyncpa [#allocation7 + $0x1], 0 }
  0x11   :  { %24 = vsyncpa [#allocation8], 0 }
  0x12   :  { %26 = vsyncpa [#allocation8 + $0x1], 0  ;;  %s1305_s0 = smov 0   ;;  %s1307_s7 = smov 0  }
  0x13   :  { %s1309_s12 = smov 0   ;;  %s1311_s13 = smov 0  }
  0x14 LB: > { %s1326_s14 = sadd.s32 4294967295, %s1244_s13   ;;  %s941_s15 = sadd.s32 4294967294, %s1244_s13   ;;  %s1244_s13 = sphi %s1311_s13, %s1541_s13   ;;  %s1240_s12 = sphi %s1309_s12, %s1540_s12   ;;  %s1236_s7 = sphi %s1307_s7, %s1539_s7   ;;  %s1232_s0 = sphi %s1305_s0, %s1538_s0  }
  0x15   : > { %s1330_s16 = sadd.s32 1, %s1244_s13   ;;  %s39_s17 = sadd.s32 1, %s1240_s12 }
  0x16   : > { %s36_s18 = ssub.s32 %s1244_s13, %s1330_s16  ;;  %p46_p5 = scmp.ne.s32.totalorder %s1240_s12, %s1236_s7 }
  0x17   : > { %p37_p6 = scmp.eq.s32.totalorder %s36_s18, 0  ;;  %p47_p7 = scmp.eq.s32.totalorder %s1244_s13, 0 }
  0x18   : > { %p52_p8 = scmp.ne.s32.totalorder %s1236_s7, %s1232_s0  ;;  %p53_p9 = scmp.eq.s32.totalorder %s1326_s14, 0 }
  0x19   : > { %s1342_s19 = scalar_select %p37_p6, %s1240_s12, %s39_s17  }
  0x1a   : > { %p48_p10 = por %p47_p7, %p46_p5  ;;  %p1344_p11 = por %p53_p9, %p52_p8 }
  0x1b   : > { %p207_p12 = scmp.eq.s32.totalorder %s1326_s14, 1  ;;  %p213_p13 = scmp.eq.s32.totalorder %s941_s15, 1 }
  0x1c   : > { %s1529_s20 = scalar_select %p1344_p11, 1, 0 }
  0x1d   : > { %p1070_p1 = scmp.lt.s32.totalorder %s1244_s13, 2  ;;  %p1351_p2 = por %p207_p12, %p46_p5 }
  0x1e   : > { %p1355_p3 = por %p213_p13, %p52_p8  ;;  %s248_s23 = sand.u32 1, %s1240_s12  }
  0x1f   : > { %s1530_s21 = scalar_select %p1351_p2, 1, 0 }
  0x20   : > { %s1531_s22 = scalar_select %p1355_p3, 1, 0 }
  0x21   : > { %s944_s24 = sshll.u32 %s1244_s13, 7  ;;  %s1056_s25 = smul.u32 288, %s248_s23 }
  0x22   : > { %s1364_s28 = scalar_lea.hbm %s1519_s1, %s944_s24  ;;  %p1366_p4 = pnand %p1070_p1, %p48_p10 }
  0x23   : > { %s252_s30 = scalar_lea.vmem [#allocation6], %s1056_s25  ;;  %s1373_s10 = scalar_lea.sflag [#allocation7], %s248_s23 }
  0x24   : > { %s258_s9 = sshll.u32 %s252_s30, 4  ;;  %s1150_s11 = scalar_lea.hbm %s1364_s28, 4608  ;;  %s1370_s9 = int_to_ptr.vmem [resolvable:$true] %s258_s9 }
  0x25   : > { %p1151_p6 = scmp.ne.s32.totalorder %s1364_s28, %s1150_s11  ;;  %p1152_p7 = pneg %p1366_p4 }
  0x26   : > { %s1155_s18 = scalar_lea.hbm %s1519_s1, 9216  ;;  %p1156_p10 = scmp.lt.s32.totalorder %s1364_s28, %s1519_s1 }
  0x27   : > { %p1153_p8 = pnand %p1152_p7, %p1151_p6  ;;  %p1157_p12 = scmp.lt.s32.totalorder %s1155_s18, %s1150_s11 }
  0x29   : > { %p1154_p9 = pneg %p1153_p8  ;;  %p1158_p13 = por %p1157_p12, %p1156_p10 }
  0x2b   : > { %p1159_p1 = pnand %p1158_p13, %p1154_p9 }
  0x2d   : > { %1162 = shalt.err (!%p1159_p1)
}
  0x2e   : > { %s1163_s23 = scalar_lea.vmem %s1370_s9, 4608  ;;  %s1247_s25 = smov [#allocation6]  }
  0x2f   : > { %p1164_p0 = scmp.ne.s32.totalorder %s1370_s9, %s1163_s23  ;;  %s1168_s27 = sshll.u32 %s1247_s25, 4  ;;  %s1169_s27 = int_to_ptr.vmem [resolvable:$false] %s1168_s27 }
  0x30   : > { %s1170_s30 = scalar_lea.vmem %s1169_s27, 9216  ;;  %p1171_p8 = scmp.lt.s32.totalorder %s1370_s9, %s1169_s27 }
  0x31   : > { %p1166_p5 = pnand %p1164_p0, %p1152_p7  ;;  %p1172_p3 = scmp.lt.s32.totalorder %s1170_s30, %s1163_s23 }
  0x33   : > { %p1167_p6 = pneg %p1166_p5  ;;  %p1173_p2 = por %p1172_p3, %p1171_p8 }
  0x35   : > { %p1174_p11 = pnand %p1173_p2, %p1167_p6 }
  0x37   : > { %1177 = shalt.err (!%p1174_p11)
}
  0x38   : > { %s1248_s11 = smov 256   ;;  %s1249_s15 = smov 128  }
  0x39   : > { %s1250_s17 = smov 8   ;;  %p273_p0 = scmp.lt.s32.totalorder %s1244_s13, 3 }
  0x3a   : > { %1065 = dma.hbm_to_vmem [thread:$0]  (!%p1366_p4), %s1364_s28, 4608, %s1370_s9, %s1373_s10, %s1248_s11, %s1249_s15, %s1250_s17  }
  0x3b   : > { %p1533_p5 = scmp.ge.s32.totalorder %s1244_s13, 1 }
  0x3d   : > { %p274_p7 = pnand %p1533_p5, %p273_p0 }
  0x3e   : > { %s1398_s18 = sand.u32 (!%p274_p7), 1, %s1236_s7   ;;  %p1534_p11 = scmp.ne.s32.totalorder (!%p274_p7), %s1529_s20, 0 }
  0x3f   : > { %277 = sbr.rel (%p274_p7) target bundleno = 575 (0x23f), region = 48  ;;  %s280_s26 = scalar_lea.sflag (!%p274_p7), [#allocation7], %s1398_s18 }
  0x40   : > { %s1057_s24 = smul.u32 (!%p274_p7), 288, %s1398_s18 }
  0x42   : > { %s283_s23 = scalar_lea.vmem (!%p274_p7), [#allocation6], %s1057_s24 }
  0x44   : > { %1223 = dma.done.wait (%p1534_p11), %s280_s26, 4608  }
  0x45   : > { %1225 = vsyncadd (%p1534_p11), %s280_s26, 4294962688  ;;  %s323_s29 = sld [smem:[#allocation4]]  ;;  %v1251_v1 = vmov 0   ;;  %v546_v2 = vld [vmem:[%s1523_s5] sm:$0xff]  ;;  %v548_v3 = vld [vmem:[%s1523_s5 + $0x10] sm:$0xff]  ;;  %vm725_vm0 = vcmask 261120  }
  0x46   : > { %682 = vmatprep.mubr.bf16.mxu0 %v1251_v1  ;;  %1111 = vset.pattern.permute.xlu1 %v1251_v1  ;;  %s965_s28 = sld [smem:[#allocation4 + $0x1]]  ;;  %p318_p2 = scmp.lt.s32.totalorder %s1326_s14, 1 }
  0x47   : > { %1110 = vset.pattern.permute.xlu0 %v1251_v1  ;;  %761 = vmatprep.mubr.bf16.mxu1 %v1251_v1  ;;  %p1535_p4 = scmp.ne.s32.totalorder %s1530_s21, 0  ;;  %s1253_s26 = smov [#allocation9]  }
  0x48   : > { %552 = vperm.xlu1 %1111, %v546_v2   ;;  %562 = vperm.xlu0 %1110, %v548_v3   ;;  %v547_v3 = vld [vmem:[%s1523_s5 + $0x8] sm:$0xff]  ;;  %s319_s17 = scalar_select %p318_p2, %s1326_s14, 1 }
  0x4a   : > { %s947_s24 = sshll.u32 %s319_s17, 1  ;;  %s842_s17 = scalar_lea.sflag [#allocation8], %s1398_s18 }
  0x4b   : > { %s948_s9 = sadd.s32 8, %s323_s29  ;;  %s321_s29 = scalar_lea.vmem %s1520_s2, %s947_s24 }
  0x4c   : > { %s1410_s10 = scalar_lea.vmem %s283_s23, %s948_s9 [#allocation6]  ;;  %s966_s20 = sadd.s32 8, %s965_s28  ;;  %557 = vperm.xlu1 %1111, %v547_v3  }
  0x4d   : > { %v340_v4 = vld [vmem:[%s1410_s10 + $0x70] sm:$0xff]  ;;  %v341_v5 = vld [vmem:[%s1410_s10 + $0x78] sm:$0xff]  ;;  %s1420_s15 = scalar_lea.vmem %s283_s23, %s966_s20 [#allocation6]  ;;  %v338_v6 = vld [vmem:[%s1410_s10 + $0x60] sm:$0xff]  ;;  %s1055_s20 = sshll.u32 %s1326_s14, 5 }
  0x4e   : > { %v1037_v7 = vpack.c.bf16 %v340_v4, %v340_v4  ;;  %v1038_v8 = vpack.c.bf16 %v341_v5, %v341_v5  ;;  %v981_v9 = vld [vmem:[%s1420_s15 + $0x100] sm:$0xff]  ;;  %v982_v10 = vld [vmem:[%s1420_s15 + $0x108] sm:$0xff]  ;;  %v1035_v12 = vpack.c.bf16 %v338_v6, %v338_v6  ;;  %v979_v16 = vld [vmem:[%s1420_s15 + $0xf0] sm:$0xff]  ;;  %s1182_s23 = sshll.u32 %s1253_s26, 4  ;;  %s1183_s23 = int_to_ptr.vmem [resolvable:$false] %s1182_s23 }
  0x4f   : > { %v339_v11 = vld [vmem:[%s1410_s10 + $0x68] sm:$0xff]  ;;  %v1053_v13 = vpack.c.bf16 %v981_v9, %v981_v9  ;;  %v1054_v14 = vpack.c.bf16 %v982_v10, %v982_v10  ;;  %v980_v17 = vld [vmem:[%s1420_s15 + $0xf8] sm:$0xff]  ;;  %v336_v18 = vld [vmem:[%s1410_s10 + $0x50] sm:$0xff]  ;;  %v1051_v19 = vpack.c.bf16 %v979_v16, %v979_v16  ;;  %s1184_s14 = scalar_lea.vmem %s1183_s23, 64 }
  0x50   : > { %v1036_v15 = vpack.c.bf16 %v339_v11, %v339_v11  ;;  %420 = vst [vmem:[#allocation2 + $0x70] sm:$0xf] %v1037_v7  ;;  %421 = vst [vmem:[#allocation2 + $0x78] sm:$0xf] %v1038_v8  ;;  %v1052_v20 = vpack.c.bf16 %v980_v17, %v980_v17  ;;  %v337_v21 = vld [vmem:[%s1410_s10 + $0x58] sm:$0xff]  ;;  %v1033_v22 = vpack.c.bf16 %v336_v18, %v336_v18  ;;  %v977_v23 = vld [vmem:[%s1420_s15 + $0xe0] sm:$0xff] }
  0x51   : > { %418 = vst [vmem:[#allocation2 + $0x60] sm:$0xf] %v1035_v12  ;;  %v978_v24 = vld [vmem:[%s1420_s15 + $0xe8] sm:$0xff]  ;;  %520 = vst [vmem:[#allocation2 + $0x74] sm:$0xf] %v1053_v13  ;;  %v1034_v25 = vpack.c.bf16 %v337_v21, %v337_v21  ;;  %v1049_v26 = vpack.c.bf16 %v977_v23, %v977_v23  ;;  %v334_v28 = vld [vmem:[%s1410_s10 + $0x40] sm:$0xff] }
  0x52   : > { %521 = vst [vmem:[#allocation2 + $0x7c] sm:$0xf] %v1054_v14  ;;  %419 = vst [vmem:[#allocation2 + $0x68] sm:$0xf] %v1036_v15  ;;  %v1050_v27 = vpack.c.bf16 %v978_v24, %v978_v24  ;;  %v335_v29 = vld [vmem:[%s1410_s10 + $0x48] sm:$0xff]  ;;  %v975_v30 = vld [vmem:[%s1420_s15 + $0xd0] sm:$0xff]  ;;  %v1031_v31 = vpack.c.bf16 %v334_v28, %v334_v28 }
  0x53   : > { %518 = vst [vmem:[#allocation2 + $0x64] sm:$0xf] %v1051_v19  ;;  %519 = vst [vmem:[#allocation2 + $0x6c] sm:$0xf] %v1052_v20  ;;  %v1032_v32 = vpack.c.bf16 %v335_v29, %v335_v29  ;;  %v976_v33 = vld [vmem:[%s1420_s15 + $0xd8] sm:$0xff]  ;;  %v1047_v34 = vpack.c.bf16 %v975_v30, %v975_v30  ;;  %v332_v35 = vld [vmem:[%s1410_s10 + $0x30] sm:$0xff] }
  0x54   : > { %416 = vst [vmem:[#allocation2 + $0x50] sm:$0xf] %v1033_v22  ;;  %v333_v36 = vld [vmem:[%s1410_s10 + $0x38] sm:$0xff]  ;;  %417 = vst [vmem:[#allocation2 + $0x58] sm:$0xf] %v1034_v25  ;;  %v1048_v37 = vpack.c.bf16 %v976_v33, %v976_v33  ;;  %v1029_v38 = vpack.c.bf16 %v332_v35, %v332_v35  ;;  %v973_v40 = vld [vmem:[%s1420_s15 + $0xc0] sm:$0xff] }
  0x55   : > { %516 = vst [vmem:[#allocation2 + $0x54] sm:$0xf] %v1049_v26  ;;  %517 = vst [vmem:[#allocation2 + $0x5c] sm:$0xf] %v1050_v27  ;;  %v1030_v39 = vpack.c.bf16 %v333_v36, %v333_v36  ;;  %v974_v41 = vld [vmem:[%s1420_s15 + $0xc8] sm:$0xff]  ;;  %v330_v42 = vld [vmem:[%s1410_s10 + $0x20] sm:$0xff]  ;;  %v1045_v43 = vpack.c.bf16 %v973_v40, %v973_v40 }
  0x56   : > { %414 = vst [vmem:[#allocation2 + $0x40] sm:$0xf] %v1031_v31  ;;  %415 = vst [vmem:[#allocation2 + $0x48] sm:$0xf] %v1032_v32  ;;  %v1046_v44 = vpack.c.bf16 %v974_v41, %v974_v41  ;;  %v331_v45 = vld [vmem:[%s1410_s10 + $0x28] sm:$0xff]  ;;  %v1027_v46 = vpack.c.bf16 %v330_v42, %v330_v42  ;;  %v971_v47 = vld [vmem:[%s1420_s15 + $0xb0] sm:$0xff] }
  0x57   : > { %514 = vst [vmem:[#allocation2 + $0x44] sm:$0xf] %v1047_v34  ;;  %v972_v48 = vld [vmem:[%s1420_s15 + $0xb8] sm:$0xff]  ;;  %515 = vst [vmem:[#allocation2 + $0x4c] sm:$0xf] %v1048_v37  ;;  %v1028_v49 = vpack.c.bf16 %v331_v45, %v331_v45  ;;  %v1043_v50 = vpack.c.bf16 %v971_v47, %v971_v47  ;;  %v328_v52 = vld [vmem:[%s1410_s10 + $0x10] sm:$0xff] }
  0x58   : > { %412 = vst [vmem:[#allocation2 + $0x30] sm:$0xf] %v1029_v38  ;;  %413 = vst [vmem:[#allocation2 + $0x38] sm:$0xf] %v1030_v39  ;;  %v1044_v51 = vpack.c.bf16 %v972_v48, %v972_v48  ;;  %v329_v53 = vld [vmem:[%s1410_s10 + $0x18] sm:$0xff]  ;;  %v969_v54 = vld [vmem:[%s1420_s15 + $0xa0] sm:$0xff]  ;;  %v1025_v55 = vpack.c.bf16 %v328_v52, %v328_v52 }
  0x59   : > { %512 = vst [vmem:[#allocation2 + $0x34] sm:$0xf] %v1045_v43  ;;  %513 = vst [vmem:[#allocation2 + $0x3c] sm:$0xf] %v1046_v44  ;;  %v1026_v56 = vpack.c.bf16 %v329_v53, %v329_v53  ;;  %v970_v57 = vld [vmem:[%s1420_s15 + $0xa8] sm:$0xff]  ;;  %v1041_v58 = vpack.c.bf16 %v969_v54, %v969_v54  ;;  %v326_v59 = vld [vmem:[%s1410_s10] sm:$0xff] }
  0x5a   : > { %410 = vst [vmem:[#allocation2 + $0x20] sm:$0xf] %v1027_v46  ;;  %v327_v60 = vld [vmem:[%s1410_s10 + $0x8] sm:$0xff]  ;;  %411 = vst [vmem:[#allocation2 + $0x28] sm:$0xf] %v1028_v49  ;;  %v1042_v61 = vpack.c.bf16 %v970_v57, %v970_v57  ;;  %v1023_v62 = vpack.c.bf16 %v326_v59, %v326_v59  ;;  %v967_v0 = vld [vmem:[%s1420_s15 + $0x90] sm:$0xff] }
  0x5b   : > { %510 = vst [vmem:[#allocation2 + $0x24] sm:$0xf] %v1043_v50  ;;  %511 = vst [vmem:[#allocation2 + $0x2c] sm:$0xf] %v1044_v51  ;;  %v1024_v63 = vpack.c.bf16 %v327_v60, %v327_v60  ;;  %v968_v2 = vld [vmem:[%s1420_s15 + $0x98] sm:$0xff]  ;;  %v1039_v5 = vpack.c.bf16 %v967_v0, %v967_v0  ;;  %v538_v24 = vld [vmem:[%s1522_s4] sm:$0xff]  ;;  %v721_v0 = vlaneseq  ;;  %s854_s15 = scalar_lea.hbm %s1525_s8, %s1055_s20 }
  0x5c   : > { %v1112_v4 = vld [vmem:[#allocation2 + $0x74] ss:$8 sps:$4 sm:$0xff]   ;;  %408 = vst [vmem:[#allocation2 + $0x10] sm:$0xf] %v1025_v55  ;;  %409 = vst [vmem:[#allocation2 + $0x18] sm:$0xf] %v1026_v56  ;;  %v1040_v6 = vpack.c.bf16 %v968_v2, %v968_v2 }
  0x5d   : > { %508 = vst [vmem:[#allocation2 + $0x14] sm:$0xf] %v1041_v58  ;;  %v1114_v7 = vld [vmem:[#allocation2 + $0x70] ss:$8 sps:$4 sm:$0xff]   ;;  %509 = vst [vmem:[#allocation2 + $0x1c] sm:$0xf] %v1042_v61  ;;  %650 = vmatprep.subr.bf16.mxu0 %v1112_v4 }
  0x5e   : > { %406 = vst [vmem:[#allocation2] sm:$0xf] %v1023_v62  ;;  %407 = vst [vmem:[#allocation2 + $0x8] sm:$0xf] %v1024_v63  ;;  %v1115_v8 = vld [vmem:[#allocation2 + $0x64] ss:$8 sps:$4 sm:$0xff]   ;;  %651 = vmatpush1.bf16.msra.mxu0 %v1114_v7 }
  0x5f   : > { %506 = vst [vmem:[#allocation2 + $0x4] sm:$0xf] %v1039_v5  ;;  %507 = vst [vmem:[#allocation2 + $0xc] sm:$0xf] %v1040_v6  ;;  %v1117_v9 = vld [vmem:[#allocation2 + $0x60] ss:$8 sps:$4 sm:$0xff]   ;;  %652 = vmatprep.subr.bf16.mxu0 %v1115_v8 }
  0x60   : > { %v1118_v10 = vld [vmem:[#allocation2 + $0x54] ss:$8 sps:$4 sm:$0xff]   ;;  %v1120_v11 = vld [vmem:[#allocation2 + $0x50] ss:$8 sps:$4 sm:$0xff]   ;;  %v1121_v12 = vld [vmem:[#allocation2 + $0x44] ss:$8 sps:$4 sm:$0xff]  }
  0x61   : > { %v549_v13 = vld [vmem:[%s1523_s5 + $0x18] sm:$0xff]  ;;  %v1123_v14 = vld [vmem:[#allocation2 + $0x40] ss:$8 sps:$4 sm:$0xff]   ;;  %v540_v27 = vld [vmem:[%s1522_s4 + $0x10] sm:$0xff]  ;;  %v722_v2 = vshrl.u32 %v721_v0, 7  ;;  %s946_s10 = sshll.u32 %s1398_s18, 1 }
  0x62   : > { %653 = vmatpush1.bf16.msra.mxu0 %v1117_v9  ;;  %567 = vperm.xlu0 %1110, %v549_v13   ;;  %v1124_v15 = vld [vmem:[#allocation2 + $0x34] ss:$8 sps:$4 sm:$0xff]   ;;  %v715_v16 = vld [vmem:[#allocation5] sm:$0x1]  ;;  %v1126_v17 = vld [vmem:[#allocation2 + $0x30] ss:$8 sps:$4 sm:$0xff]  }
  0x63   : > { %654 = vmatprep.subr.bf16.mxu0 %v1118_v10  ;;  %v1127_v18 = vld [vmem:[#allocation2 + $0x24] ss:$8 sps:$4 sm:$0xff]   ;;  %v1129_v19 = vld [vmem:[#allocation2 + $0x20] ss:$8 sps:$4 sm:$0xff]   ;;  %v1132_v21 = vld [vmem:[#allocation2 + $0x10] ss:$8 sps:$4 sm:$0xff]  }
  0x64   : > { %v1130_v20 = vld [vmem:[#allocation2 + $0x14] ss:$8 sps:$4 sm:$0xff]   ;;  %v539_v25 = vld [vmem:[%s1522_s4 + $0x8] sm:$0xff]  ;;  %v544_v60 = vld [vmem:[%s1524_s6] sm:$0x1]  ;;  %v723_v4 = vsub.s32 0, %v722_v2 }
  0x65   : > { %v1135_v23 = vld [vmem:[#allocation2] ss:$8 sps:$4 sm:$0xff]   ;;  %v542_v26 = vpack.c.bf16 %v539_v25, %v538_v24  ;;  %v541_v28 = vld [vmem:[%s1522_s4 + $0x18] sm:$0xff]  ;;  %v545_v62 = vpack.c.bf16 %v544_v60, %v544_v60  ;;  %v780_v10 = vsub.s32 1, %v722_v2  ;;  %s317_s25 = scalar_lea.vmem [#allocation9], %s946_s10  ;;  %vm838_vm3 = vcmp.lt.s32.totalorder %v721_v0, 256 }
  0x66   : > { %655 = vmatpush1.bf16.msra.mxu0 %v1120_v11  ;;  %718 = vperm.xlu0 %1110, %v715_v16   ;;  %v1133_v22 = vld [vmem:[#allocation2 + $0x4] ss:$8 sps:$4 sm:$0xff]   ;;  %v543_v29 = vpack.c.bf16 %v541_v28, %v540_v27  ;;  %v786_v63 = vld [vmem:[%s321_s29] sm:$0x3]  ;;  %s856_s27 = sshll.u32 %s317_s25, 4  ;;  %s857_s27 = int_to_ptr.vmem [resolvable:$true] %s856_s27 }
  0x67   : > { %656 = vmatprep.subr.bf16.mxu0 %v1121_v12  ;;  %1136 = vlog2.f32 %v786_v63  ;;  %v772_v7 = vld [vmem:[%s1521_s3] sm:$0x3]  ;;  %s1178_s24 = scalar_lea.vmem %s857_s27, 32  ;;  %p1185_p12 = scmp.lt.s32.totalorder %s857_s27, %s1183_s23 }
  0x68   : > { %v777_v13 = vrot.slane %v772_v7, %v723_v4  ;;  %p1179_p3 = scmp.ne.s32.totalorder %s857_s27, %s1178_s24  ;;  %p1186_p13 = scmp.lt.s32.totalorder %s1184_s14, %s1178_s24 }
  0x6a   : > { %657 = vmatpush1.bf16.msra.mxu0 %v1123_v14  ;;  %p1180_p9 = pnand %p1179_p3, %p1535_p4  ;;  %p1187_p1 = por %p1186_p13, %p1185_p12 }
  0x6b   : > { %658 = vmatprep.subr.bf16.mxu0 %v1124_v15 }
  0x6c   : > { %p1181_p10 = pneg %p1180_p9 }
  0x6e   : > { %659 = vmatpush1.bf16.msra.mxu0 %v1126_v17  ;;  %p1188_p6 = pnand %p1187_p1, %p1181_p10 }
  0x6f   : > { %660 = vmatprep.subr.bf16.mxu0 %v1127_v18  ;;  %v781_v18 = vrot.slane %v772_v7, %v780_v10 }
  0x72   : > { %661 = vmatpush1.bf16.msra.mxu0 %v1129_v19 }
  0x73   : > { %662 = vmatprep.subr.bf16.mxu0 %v1130_v20 }
  0x74   : > { %v1137_v3 = vpop.eup %1136 }
  0x75   : > { %v788_v5 = vmul.f32 0.6931472, %v1137_v3 }
  0x76   : > { %663 = vmatpush1.bf16.msra.mxu0 %v1132_v21 }
  0x77   : > { %664 = vmatprep.subr.bf16.mxu0 %v1133_v22  ;;  %v790_v9 = vmul.f32 1.442695, %v788_v5 }
  0x79   : > { %v795_v16 = vrot.slane %v790_v9, %v723_v4  ;;  %v799_v22 = vrot.slane %v790_v9, %v780_v10 }
  0x7a   : > { %665 = vmatpush1.bf16.msra.mxu0 %v1135_v23 }
  0x7d   : > { %683 = vmatmul.mubr.bf16.vlgmr.msra.gmra.mxu0 %v542_v26  ;;  %v1252_v26 = vmov 1966171168  }
  0x7e   : > { %692 = vmatprep.mubr.bf16.mxu0 %v1251_v1  ;;  %v822_v27 = vunpack.c.l.s4 %v1252_v26 }
  0x85   : > { %693 = vmatmul.mubr.bf16.gmra.mxu0 %v543_v29 }
  0xc3   : > { %v553_v33 = vpop.permute.xlu1 %552  ;;  %v563_v34 = vpop.permute.xlu0 %562 }
  0xc7   : > { %v558_v38 = vpop.permute.xlu1 %557 }
  0xdd   : > { %v568_v1 = vpop.permute.xlu0 %567 }
  0xe1   : > { %v719_v6 = vpop.permute.xlu0 %718 }
  0xe2   : > { %v724_v8 = vrot.slane %v719_v6, %v723_v4 }
 0x13d   : > { %v684_v30 = vpop.f32.mrf.mxu0 }
 0x13e   : > { %v685_v52 = vadd.f32 %v684_v30, %v553_v33 }
 0x13f   : > { %v686_v31 = vpop.f32.mrf.mxu0 }
 0x140   : > { %v687_v45 = vadd.f32 %v686_v31, %v553_v33  ;;  %v703_v59 = vmax.f32 %v685_v52, 0.0  ;;  %v823_v33 = vunpack.c.0.s8 %v822_v27 }
 0x141   : > { %v688_v32 = vpop.f32.mrf.mxu0 }
 0x142   : > { %v689_v47 = vadd.f32 %v688_v32, %v558_v38  ;;  %v704_v54 = vmax.f32 %v687_v45, 0.0 }
 0x143   : > { %v690_v35 = vpop.f32.mrf.mxu0 }
 0x144   : > { %v691_v40 = vadd.f32 %v690_v35, %v558_v38  ;;  %v705_v56 = vmax.f32 %v689_v47, 0.0 }
 0x145   : > { %v694_v36 = vpop.f32.mrf.mxu0 }
 0x146   : > { %v695_v43 = vadd.f32 %v694_v36, %v563_v34  ;;  %v706_v49 = vmax.f32 %v691_v40, 0.0  ;;  %v711_v61 = vpack.c.bf16 %v705_v56, %v703_v59 }
 0x147   : > { %v696_v37 = vpop.f32.mrf.mxu0 }
 0x148   : > { %v697_v41 = vadd.f32 %v696_v37, %v563_v34  ;;  %v707_v53 = vmax.f32 %v695_v43, 0.0  ;;  %v712_v58 = vpack.c.bf16 %v706_v49, %v704_v54 }
 0x149   : > { %v698_v39 = vpop.f32.mrf.mxu0 }
 0x14a   : > { %v699_v42 = vadd.f32 %v698_v39, %v568_v1  ;;  %v708_v50 = vmax.f32 %v697_v41, 0.0  ;;  %v826_v39 = vsub.s32 %v823_v33, %v722_v2 }
 0x14b   : > { %v700_v44 = vpop.f32.mrf.mxu0 }
 0x14c   : > { %v701_v46 = vadd.f32 %v700_v44, %v568_v1  ;;  %v709_v48 = vmax.f32 %v699_v42, 0.0 }
 0x14e   : > { %v710_v51 = vmax.f32 %v701_v46, 0.0  ;;  %v713_v57 = vpack.c.bf16 %v709_v48, %v707_v53 }
 0x150   : > { %v714_v55 = vpack.c.bf16 %v710_v51, %v708_v50 }
 0x152   : > { %741 = vmatprep.subr.bf16.mxu1 %v714_v55 }
 0x153   : > { %742 = vmatpush1.bf16.msra.mxu1 %v713_v57 }
 0x154   : > { %743 = vmatprep.subr.bf16.mxu1 %v712_v58 }
 0x157   : > { %744 = vmatpush1.bf16.msra.mxu1 %v711_v61 }
 0x15a   : > { %1015 = vmatmul.mubr.msk.bf16.vlgmr.msra.gmra.mxu1 %vm725_vm0, %v545_v62 }
 0x21a   : > { %v763_v11 = vpop.f32.mrf.mxu1 }
 0x21b   : > { %v764_v12 = vadd.f32 %v763_v11, %v724_v8 }
 0x21c   : > { %v765_v14 = vpop.f32.mrf.mxu1 }
 0x21d   : > { %v770_v15 = vmul.f32 1.442695, %v764_v12  ;;  %v766_v17 = vadd.f32 %v765_v14, %v724_v8 }
 0x21e   : > { %v767_v19 = vpop.f32.mrf.mxu1 }
 0x21f   : > { %v784_v20 = vadd.f32 %v777_v13, %v770_v15  ;;  %v771_v21 = vmul.f32 1.442695, %v766_v17 }
 0x220   : > { %v768_v23 = vpop.f32.mrf.mxu1 }
 0x221   : > { %v802_v24 = vsub.f32 %v784_v20, %v795_v16  ;;  %v785_v25 = vadd.f32 %v781_v18, %v771_v21 }
 0x223   : > { %v804_v28 = vand.u32 2147483647, %v802_v24  ;;  %v803_v29 = vsub.f32 %v785_v25, %v799_v22  ;;  %v808_v30 = vmul.f32 0.5, %v802_v24 }
 0x225   : > { %v1016_v31 = vadd.f32 -0.0625, %v804_v28  ;;  %v805_v32 = vand.u32 2147483647, %v803_v29  ;;  %v809_v34 = vmul.f32 0.5, %v803_v29  ;;  %v810_v37 = vmul.f32 %v808_v30, %v802_v24 }
 0x226   : > { %vm806_vm1 = vcmp.le.f32.partialorder %v804_v28, 0.125 }
 0x227   : > { %v814_v35 = vmul.f32 0.125, %v1016_v31  ;;  %v1017_v36 = vadd.f32 -0.0625, %v805_v32  ;;  %v811_v38 = vmul.f32 %v809_v34, %v803_v29  ;;  %vm807_vm2 = vcmp.le.f32.partialorder %v805_v32, 0.125 }
 0x229   : > { %v815_v1 = vmul.f32 0.125, %v1017_v36  ;;  %v816_v40 = vsel %vm806_vm1, %v810_v37, %v814_v35 }
 0x22b   : > { %v817_v41 = vsel %vm807_vm2, %v811_v38, %v815_v1 }
 0x22c   : > { %v820_v42 = vcombine.low %v816_v40, %v817_v41 }
 0x22e   : > { %v827_v43 = vrot.slane %v820_v42, %v826_v39 }
 0x230   : > { %v834_v44 = vrot.slane %v827_v43, %v826_v39 }
 0x232   : > { %840 = vst.msk [vmem:[%s317_s25] sm:$0x3] %vm838_vm3, %v834_v44 }
 0x233   : > { %1191 = shalt.err (!%p1188_p6)
}
 0x234   : > { %s1192_s29 = scalar_lea.hbm %s854_s15, 32  ;;  %s1196_s9 = scalar_lea.hbm %s1525_s8, 64 }
 0x235   : > { %p1193_p8 = scmp.ne.s32.totalorder %s854_s15, %s1192_s29  ;;  %p1197_p7 = scmp.lt.s32.totalorder %s854_s15, %s1525_s8 }
 0x236   : > { %p1198_p11 = scmp.lt.s32.totalorder %s1196_s9, %s1192_s29 }
 0x237   : > { %p1194_p0 = pnand %p1193_p8, %p1535_p4 }
 0x238   : > { %p1199_p2 = por %p1198_p11, %p1197_p7 }
 0x239   : > { %p1195_p5 = pneg %p1194_p0 }
 0x23b   : > { %p1200_p3 = pnand %p1199_p2, %p1195_p5 }
 0x23d   : > { %1203 = shalt.err (!%p1200_p3)
}
 0x23e   : > { %1060 = dma.vmem_to_hbm [thread:$0]  (%p1535_p4), %s857_s27, 32, %s854_s15, %s842_s17  }
 0x23f PF: > { %s868_s25 = sand.u32 1, %s1232_s0   ;;  %p1536_p9 = scmp.ne.s32.totalorder %s1531_s22, 0 }
 0x240   : > { %p1537_p10 = scmp.ge.s32.totalorder %s1244_s13, 2  ;;  %s869_s30 = scalar_lea.sflag [#allocation8], %s868_s25 }
 0x242   : > { %p1067_p12 = pnand %p1537_p10, %p1536_p9 }
 0x244   : > { %p1068_p13 = pneg %p1067_p12 }
 0x246   : > { %1227 = dma.done.wait (%p1068_p13), %s869_s30, 32  }
 0x247   : > { %1229 = vsyncadd (%p1068_p13), %s869_s30, 4294967264  ;;  %p29_p1 = scmp.ge.s32.totalorder %s1330_s16, 4   ;;  %s1538_s0 = smov %s1236_s7 }
 0x248   : > { %s1539_s7 = smov %s1240_s12  ;;  %s1540_s12 = smov %s1342_s19 }
 0x249   : > { %s1541_s13 = smov %s1330_s16  ;;  %31 = sbr.rel (!%p29_p1) target bundleno = 20 (0x14), region = 98 }
 0x24e   :  { %874 = vsyncpa [#allocation7], 1 }
 0x24f   :  { %876 = vsyncpa [#allocation7 + $0x1], 1 }
 0x250   :  { %877 = vsyncpa [#allocation8], 1 }
 0x251   :  { %879 = vsyncpa [#allocation8 + $0x1], 1 }

</bundles_post_ra>
